<compile_context>
chip_gen: v7x
topology: tpu7x:2x2x1
jax: 0.10.0
libtpu: 0.0.40
codegen_flags: <defaults>
</compile_context>

<pallas_src>
import functools

import jax
import jax.numpy as jnp
from jax.experimental import pallas as pl
from jax.experimental.pallas import tpu as pltpu

ALPHA = 1.0
GAMMA = 3            # integer power -> expanded to multiplies (no pow)

_LANE = 128
_MAX_ROW_TILE = 8192   # DMA block: (8192, 128) f32 = 4 MiB per x buffer
_CHUNK_ROWS = 1024     # in-kernel compute chunk: bounds live temporaries


def _focal_loss_kernel(x_ref, t_ref, out_ref, *, chunk_rows, n_chunks,
                       out_sub, tail_valid, binary_targets):
    """Sum focal loss over one (n_chunks*chunk_rows, 128) block into a small
    (out_sub, 128) partial-sum tile."""

    def chunk_loss(x, t, base_elem):
        # base_elem: None (no masking) or the block-local flat index of this
        # chunk's first element (block-local -> always fits int32).
        x = x.astype(jnp.float32)
        t = t.astype(jnp.float32)

        z = jnp.exp(-jnp.abs(x))                                   # EUP exp
        # Numerically stable BCE-with-logits (== F.binary_cross_entropy_with_logits):
        #   bce = max(x, 0) - x*t + log1p(exp(-|x|))
        bce = jnp.maximum(x, 0.0) - x * t + jnp.log1p(z)           # EUP log1p

        if binary_targets:
            # pt = exp(-bce) = exp(-(max(x,0) - x*t)) / (1 + z).  For t in
            # {0,1} the numerator is 1 when sign(x) agrees with t, else z, so
            # the second exp is not needed (saves one EUP op/elem; matters on
            # v7x where the single EUP would be co-binding at 3 transcendentals).
            num = jnp.where(jnp.logical_xor(x >= 0.0, t > 0.5), z, 1.0)
            denom = 1.0 + z
            r = pl.reciprocal(denom, approx=True)   # cheap EUP vrcp
            r = r * (2.0 - denom * r)               # 2 Newton steps (VALU):
            r = r * (2.0 - denom * r)               #   back to full f32 precision
            pt = num * r
        else:
            # Soft-target fallback: exact PyTorch formulation.
            pt = jnp.exp(-bce)

        one_minus_pt = 1.0 - pt
        w = one_minus_pt
        for _ in range(GAMMA - 1):                  # (1 - pt) ** GAMMA
            w = w * one_minus_pt
        f = w * bce
        if ALPHA != 1.0:                            # dropped at trace time
            f = ALPHA * f

        if base_elem is not None:
            # Ragged-tail mask (only traced for the last grid block when a
            # tail exists).  Also discards any garbage (NaN/Inf) read from
            # out-of-bounds rows of a ragged last block.
            rid = jax.lax.broadcasted_iota(jnp.int32, f.shape, 0)
            lid = jax.lax.broadcasted_iota(jnp.int32, f.shape, 1)
            f = jnp.where(base_elem + rid * _LANE + lid < tail_valid, f, 0.0)

        if out_sub == 8:
            # (chunk_rows,128) -> (chunk_rows//8, 8, 128); summing axis 0 is
            # plain vreg-wise VALU adds (no per-chunk cross-lane XLU reduce).
            return f.reshape(chunk_rows // 8, 8, _LANE).sum(axis=0)
        # Tiny-input path (single block, rows not a multiple of 8).
        return jnp.sum(f, axis=0, keepdims=True)

    def block_sum(masked):
        if n_chunks == 1:
            base = jnp.int32(0) if masked else None
            return chunk_loss(x_ref[...], t_ref[...], base)

        def body(c, acc):
            r0 = pl.multiple_of(c * chunk_rows, chunk_rows)
            xs = x_ref[pl.ds(r0, chunk_rows), :]
            ts = t_ref[pl.ds(r0, chunk_rows), :]
            base = c * (chunk_rows * _LANE) if masked else None
            return acc + chunk_loss(xs, ts, base)

        return jax.lax.fori_loop(0, n_chunks, body,
                                 jnp.zeros((out_sub, _LANE), jnp.float32))

    if tail_valid is None:
        # Fully aligned input: no mask anywhere.
        out_ref[...] = block_sum(masked=False)
    else:
        i = pl.program_id(0)
        last = pl.num_programs(0) - 1

        @pl.when(i != last)
        def _():
            out_ref[...] = block_sum(masked=False)   # unmasked fast path

        @pl.when(i == last)
        def _():
            out_ref[...] = block_sum(masked=True)    # masked tail block


def focal_loss_kaggle(inputs, targets, *, binary_targets=True):
    """Equivalent of FocalLossKaggle()(inputs, targets) -> scalar f32.

    Targets may arrive as bool/int8/bf16/f32 and are streamed as-is (the
    kernel upcasts).  Set binary_targets=False if targets are soft
    probabilities rather than a {0,1} mask.
    """
    assert inputs.shape == targets.shape
    n = int(inputs.size)
    assert n > 0

    x = inputs.reshape(-1)
    t = targets.reshape(-1)

    # The (rows, 128) view needs lane alignment.  For typical shapes
    # (n % 128 == 0, incl. the demo) this branch is skipped; any remaining
    # raggedness is masked in-kernel (last block only).
    pad = (-n) % _LANE
    if pad:
        x = jnp.pad(x, (0, pad))
        t = jnp.pad(t, (0, pad))
    rows = (n + pad) // _LANE

    if rows <= _CHUNK_ROWS:
        row_tile = rows            # full-dim block: always a legal BlockSpec
        chunk_rows = rows
    else:
        # Multiple of the compute chunk; last grid block may be ragged.
        row_tile = min(_MAX_ROW_TILE, (rows // _CHUNK_ROWS) * _CHUNK_ROWS)
        chunk_rows = _CHUNK_ROWS
    n_chunks = row_tile // chunk_rows
    num_blocks = pl.cdiv(rows, row_tile)
    out_sub = 8 if chunk_rows % 8 == 0 else 1

    # Valid elements in the LAST grid block (block-local, int32-safe);
    # None -> no masking needed at all.
    block_elems = row_tile * _LANE
    last_valid = n - (num_blocks - 1) * block_elems
    tail_valid = None if last_valid == block_elems else last_valid

    x2 = x.reshape(rows, _LANE)
    t2 = t.reshape(rows, _LANE)

    in_spec = pl.BlockSpec((row_tile, _LANE), lambda i: (i, 0))
    out_spec = pl.BlockSpec((out_sub, _LANE), lambda i: (i, 0))

    # Explicit VMEM budget: double-buffered input blocks + headroom for the
    # chunk-sized temporaries / outputs.  Stays well under v7x's 64 MiB
    # physical VMEM even with f32 targets at row_tile=8192.
    in_bytes = row_tile * _LANE * (x2.dtype.itemsize + t2.dtype.itemsize)
    vmem_limit = 2 * in_bytes + (16 << 20)

    partials = pl.pallas_call(
        functools.partial(_focal_loss_kernel, chunk_rows=chunk_rows,
                          n_chunks=n_chunks, out_sub=out_sub,
                          tail_valid=tail_valid,
                          binary_targets=binary_targets),
        out_shape=jax.ShapeDtypeStruct((num_blocks * out_sub, _LANE),
                                       jnp.float32),
        grid=(num_blocks,),
        in_specs=[in_spec, in_spec],
        out_specs=out_spec,
        compiler_params=pltpu.CompilerParams(
            dimension_semantics=("parallel",),
            vmem_limit_bytes=int(vmem_limit)),
    )(x2, t2)

    # Tiny final cross-lane reduce + mean in plain JAX (outside the kernel).
    return jnp.sum(partials) / jnp.float32(n)


if __name__ == "__main__":
    key = jax.random.PRNGKey(0)
    k1, k2 = jax.random.split(key)
    shape = (2, 4, 16, 16)
    # Module has no learnable parameters; just logits + binary targets.
    logits = jax.random.normal(k1, shape, dtype=jnp.float32)
    # Binary targets streamed as bf16 (lossless for {0,1}, halves HBM bytes).
    targets = (jax.random.uniform(k2, shape) > 0.5).astype(jnp.bfloat16)

    loss = focal_loss_kaggle(logits, targets)
    loss = jax.block_until_ready(loss)

    # Pure-JAX reference (same math as the PyTorch module).
    t32 = targets.astype(jnp.float32)
    bce = jnp.maximum(logits, 0.0) - logits * t32 + jnp.log1p(
        jnp.exp(-jnp.abs(logits)))
    pt = jnp.exp(-bce)
    ref = jnp.mean(ALPHA * (1.0 - pt) ** GAMMA * bce)
    assert jnp.allclose(loss, ref, rtol=1e-4, atol=1e-6), (loss, ref)

    print("KERNEL_OK")
</pallas_src>

<mosaic_0001>
module attributes {stable_mosaic.version = 11 : i64} {
  func.func @_focal_loss_kernel(%arg0: i32, %arg1: memref<16x128xf32, #tpu.memory_space<vmem>>, %arg2: memref<16x128xbf16, #tpu.memory_space<vmem>>, %arg3: memref<8x128xf32, #tpu.memory_space<vmem>>) attributes {dimension_semantics = [#tpu.dimension_semantics<parallel>], iteration_bounds = array<i64: 1>, scalar_prefetch = 0 : i64, scratch_operands = 0 : i64, tpu.core_type = #tpu.core_type<tc>, window_params = [{transform_indices = @transform_0, window_bounds = array<i64: 16, 128>}, {transform_indices = @transform_1, window_bounds = array<i64: 16, 128>}, {transform_indices = @transform_2, window_bounds = array<i64: 8, 128>}]} {
    %c0 = arith.constant 0 : index
    %c0_0 = arith.constant 0 : index
    %0 = vector.load %arg1[%c0, %c0_0] : memref<16x128xf32, #tpu.memory_space<vmem>>, vector<16x128xf32>
    %c0_1 = arith.constant 0 : index
    %c0_2 = arith.constant 0 : index
    %1 = vector.load %arg2[%c0_1, %c0_2] : memref<16x128xbf16, #tpu.memory_space<vmem>>, vector<16x128xbf16>
    %2 = arith.extf %1 : vector<16x128xbf16> to vector<16x128xf32>
    %3 = math.absf %0 : vector<16x128xf32>
    %cst = arith.constant 0.000000e+00 : f32
    %4 = vector.broadcast %cst : f32 to vector<16x128xf32>
    %5 = arith.subf %4, %3 : vector<16x128xf32>
    %6 = math.exp %5 : vector<16x128xf32>
    %cst_3 = arith.constant 0.000000e+00 : f32
    %7 = vector.broadcast %cst_3 : f32 to vector<16x128xf32>
    %8 = arith.maximumf %0, %7 : vector<16x128xf32>
    %9 = arith.mulf %0, %2 : vector<16x128xf32>
    %10 = arith.subf %8, %9 : vector<16x128xf32>
    %11 = math.log1p %6 : vector<16x128xf32>
    %12 = arith.addf %10, %11 : vector<16x128xf32>
    %cst_4 = arith.constant 0.000000e+00 : f32
    %13 = vector.broadcast %cst_4 : f32 to vector<16x128xf32>
    %14 = arith.cmpf oge, %0, %13 : vector<16x128xf32>
    %cst_5 = arith.constant 5.000000e-01 : f32
    %15 = vector.broadcast %cst_5 : f32 to vector<16x128xf32>
    %16 = arith.cmpf ogt, %2, %15 : vector<16x128xf32>
    %17 = arith.xori %14, %16 : vector<16x128xi1>
    %cst_6 = arith.constant 1.000000e+00 : f32
    %18 = vector.broadcast %cst_6 : f32 to vector<16x128xf32>
    %19 = arith.select %17, %6, %18 : vector<16x128xi1>, vector<16x128xf32>
    %cst_7 = arith.constant 1.000000e+00 : f32
    %20 = vector.broadcast %cst_7 : f32 to vector<16x128xf32>
    %21 = arith.addf %20, %6 : vector<16x128xf32>
    %22 = tpu.reciprocal %21 {approx = true} : vector<16x128xf32> -> vector<16x128xf32>
    %23 = arith.mulf %21, %22 : vector<16x128xf32>
    %cst_8 = arith.constant 2.000000e+00 : f32
    %24 = vector.broadcast %cst_8 : f32 to vector<16x128xf32>
    %25 = arith.subf %24, %23 : vector<16x128xf32>
    %26 = arith.mulf %22, %25 : vector<16x128xf32>
    %27 = arith.mulf %21, %26 : vector<16x128xf32>
    %cst_9 = arith.constant 2.000000e+00 : f32
    %28 = vector.broadcast %cst_9 : f32 to vector<16x128xf32>
    %29 = arith.subf %28, %27 : vector<16x128xf32>
    %30 = arith.mulf %26, %29 : vector<16x128xf32>
    %31 = arith.mulf %19, %30 : vector<16x128xf32>
    %cst_10 = arith.constant 1.000000e+00 : f32
    %32 = vector.broadcast %cst_10 : f32 to vector<16x128xf32>
    %33 = arith.subf %32, %31 : vector<16x128xf32>
    %34 = arith.mulf %33, %33 : vector<16x128xf32>
    %35 = arith.mulf %34, %33 : vector<16x128xf32>
    %36 = arith.mulf %35, %12 : vector<16x128xf32>
    %37 = vector.shape_cast %36 : vector<16x128xf32> to vector<2x8x128xf32>
    %cst_11 = arith.constant dense<0.000000e+00> : vector<8x128xf32>
    %38 = vector.multi_reduction <add>, %37, %cst_11 [0] : vector<2x8x128xf32> to vector<8x128xf32>
    %c0_12 = arith.constant 0 : index
    %c0_13 = arith.constant 0 : index
    %39 = vector.load %arg3[%c0_12, %c0_13] : memref<8x128xf32, #tpu.memory_space<vmem>>, vector<8x128xf32>
    tpu.vector_store %arg3[%c0_12, %c0_13], %38 {strides = array<i32>} : memref<8x128xf32, #tpu.memory_space<vmem>>, vector<8x128xf32>,
    return
  }
  func.func @transform_0(%arg0: i32) -> (i32, i32) {
    %c0_i32 = arith.constant 0 : i32
    %c0_i32_0 = arith.constant 0 : i32
    return %arg0, %c0_i32 : i32, i32
  }
  func.func @transform_1(%arg0: i32) -> (i32, i32) {
    %c0_i32 = arith.constant 0 : i32
    %c0_i32_0 = arith.constant 0 : i32
    return %arg0, %c0_i32 : i32, i32
  }
  func.func @transform_2(%arg0: i32) -> (i32, i32) {
    %c0_i32 = arith.constant 0 : i32
    %c0_i32_0 = arith.constant 0 : i32
    return %arg0, %c0_i32 : i32, i32
  }
}

</mosaic_0001>

<bundles_post_ra>
// kernel: tpu_custom_call.1
= control target key start
LH: loop header
LB: loop body
LE: loop exit
PB: predicated region body
PF: predicated region fallthrough
CT: control target
= control target key end

     0   :  { %7 = vsyncpa [#allocation3], 0  ;;  %s303_s0 = inlined_call_operand.hbm [shape: f32[16,128], index: 0, kind: input, shape index: {}]   ;;  %s304_s1 = inlined_call_operand.hbm [shape: bf16[16,128], index: 1, kind: input, shape index: {}]   ;;  %s305_s2 = inlined_call_operand.hbm [shape: f32[8,128], index: 2, kind: output, shape index: {}]  }
   0x1   :  { %8 = vsyncpa [#allocation6], 0 }
   0x2   :  { %9 = vsyncpa [#allocation4], 0  ;;  %s227_s9 = smov [#allocation2]   ;;  %s155_s13 = scalar_lea.hbm %s303_s0, 256 }
   0x3   :  { %s15_s10 = sshll.u32 %s227_s9, 4  ;;  %p156_p0 = scmp.ne.s32.totalorder %s303_s0, %s155_s13  ;;  %s16_s10 = int_to_ptr.vmem [resolvable:$true] %s15_s10 }
   0x4   :  { %p159_p1 = scmp.lt.u32.totalorder %s155_s13, %s303_s0 }
   0x6   :  { %p161_p2 = pnand %p159_p1, %p156_p0 }
   0x8   :  { %164 = shalt.err (!%p161_p2)
}
   0x9   :  { %s165_s18 = scalar_lea.vmem %s16_s10, 256  ;;  %p170_p4 = scmp.lt.s32.totalorder %s16_s10, %s16_s10 }
   0xa   :  { %p166_p3 = scmp.ne.s32.totalorder %s16_s10, %s165_s18  ;;  %p171_p5 = scmp.lt.s32.totalorder %s165_s18, %s165_s18 }
   0xc   :  { %p172_p6 = por %p171_p5, %p170_p4 }
   0xe   :  { %p173_p7 = pnand %p172_p6, %p166_p3 }
  0x10   :  { %176 = shalt.err (!%p173_p7)
}
  0x11   :  { %s228_s19 = smov 128   ;;  %s229_s20 = smov 8  }
  0x12   :  { %21 = dma.hbm_to_vmem [thread:$0]  %s303_s0, 256, %s16_s10, [#allocation3], %s228_s19, %s228_s19, %s229_s20  }
  0x13   :  { %s230_s23 = smov [#allocation5]   ;;  %s177_s27 = scalar_lea.hbm %s304_s1, 128 }
  0x14   :  { %s27_s24 = sshll.u32 %s230_s23, 4  ;;  %p178_p8 = scmp.ne.s32.totalorder %s304_s1, %s177_s27  ;;  %s28_s24 = int_to_ptr.vmem [resolvable:$true] %s27_s24 }
  0x15   :  { %p181_p9 = scmp.lt.u32.totalorder %s177_s27, %s304_s1 }
  0x17   :  { %p183_p10 = pnand %p181_p9, %p178_p8 }
  0x19   :  { %186 = shalt.err (!%p183_p10)
}
  0x1a   :  { %s187_s4 = scalar_lea.vmem %s28_s24, 128  ;;  %p192_p12 = scmp.lt.s32.totalorder %s28_s24, %s28_s24 }
  0x1b   :  { %p188_p11 = scmp.ne.s32.totalorder %s28_s24, %s187_s4  ;;  %p193_p13 = scmp.lt.s32.totalorder %s187_s4, %s187_s4 }
  0x1d   :  { %p194_p0 = por %p193_p13, %p192_p12 }
  0x1f   :  { %p195_p1 = pnand %p194_p0, %p188_p11 }
  0x21   :  { %198 = shalt.err (!%p195_p1)
}
  0x22   :  { %s231_s0 = smov 64   ;;  %s232_s5 = smov 4  }
  0x23   :  { %33 = dma.hbm_to_vmem [thread:$0]  %s304_s1, 128, %s28_s24, [#allocation6], %s231_s0, %s231_s0, %s232_s5  }
  0x24   :  { %221 = dma.done.wait [#allocation3], 256  }
  0x25   :  { %222 = vsyncadd [#allocation3], 4294967040 }
  0x26   :  { %223 = dma.done.wait [#allocation6], 128  }
  0x27   :  { %224 = vsyncadd [#allocation6], 4294967168  ;;  %v40_v0 = vld [vmem:[#allocation2] sm:$0xff]  ;;  %v273_v1 = vld [vmem:[#allocation2 + $0x8] sm:$0xff]  ;;  %s233_s1 = smov [#allocation7]  }
  0x28   :  { %v46_v2 = vand.u32 2147483647, %v40_v0  ;;  %v47_v3 = vand.u32 2147483647, %v273_v1  ;;  %v133_v12 = vld [vmem:[#allocation5] sm:$0xff]   ;;  %vm80_vm0 = vcmp.ge.f32.partialorder %v40_v0, 0.0 }
  0x29   :  { %v134_v13 = vunpack.c.l.bf16 %v133_v12  ;;  %v135_v15 = vunpack.c.h.bf16 %v133_v12  ;;  %vm81_vm2 = vcmp.ge.f32.partialorder %v273_v1, 0.0  ;;  %v54_v33 = vmax.f32 %v40_v0, 0.0  ;;  %s122_s8 = sshll.u32 %s233_s1, 4  ;;  %s123_s8 = int_to_ptr.vmem [resolvable:$true] %s122_s8 }
  0x2a   :  { %v48_v4 = vsub.f32 0.0, %v46_v2  ;;  %v49_v5 = vsub.f32 0.0, %v47_v3  ;;  %v55_v34 = vmax.f32 %v273_v1, 0.0  ;;  %s199_s9 = scalar_lea.vmem %s123_s8, 128  ;;  %p204_p3 = scmp.lt.s32.totalorder %s123_s8, %s123_s8 }
  0x2b   :  { %vm82_vm1 = vcmp.gt.f32.partialorder %v134_v13, 0.5  ;;  %vm83_vm3 = vcmp.gt.f32.partialorder %v135_v15, 0.5  ;;  %v56_v37 = vmul.f32 %v134_v13, %v40_v0  ;;  %v57_v38 = vmul.f32 %v135_v15, %v273_v1  ;;  %p200_p2 = scmp.ne.s32.totalorder %s123_s8, %s199_s9  ;;  %p205_p4 = scmp.lt.s32.totalorder %s199_s9, %s199_s9 }
  0x2c   :  { %v50_v6 = vmul.f32 1.442695, %v48_v4  ;;  %v52_v7 = vmul.f32 1.442695, %v49_v5  ;;  %vm277_vm4 = vmxor %vm80_vm0, %vm82_vm1 }
  0x2d   :  { %vm281_vm5 = vmxor %vm81_vm2, %vm83_vm3  ;;  %v58_v49 = vsub.f32 %v54_v33, %v56_v37  ;;  %v59_v51 = vsub.f32 %v55_v34, %v57_v38  ;;  %p206_p5 = por %p205_p4, %p204_p3 }
  0x2e   :  { %143 = vpow2.f32 %v50_v6 }
  0x2f   :  { %145 = vpow2.f32 %v52_v7  ;;  %p207_p6 = pnand %p206_p5, %p200_p2 }
  0x38   :  { %v144_v8 = vpop.eup %143 }
  0x39   :  { %v146_v9 = vpop.eup %145  ;;  %v60_v10 = vadd.f32 1.0, %v144_v8  ;;  %v63_v18 = vmul.f32 -0.5, %v144_v8  ;;  %v66_v28 = vand.u32 2147483647, %v144_v8  ;;  %v86_v39 = vsel %vm277_vm4, %v144_v8, 1.0 }
  0x3a   :  { %v69_v11 = vadd.f32 1.0, %v146_v9  ;;  %v72_v20 = vmul.f32 -0.5, %v146_v9  ;;  %v75_v35 = vand.u32 2147483647, %v146_v9  ;;  %v87_v43 = vsel %vm281_vm5, %v146_v9, 1.0 }
  0x3b   :  { %147 = vrcp.f32 %v60_v10  ;;  %v64_v24 = vadd.f32 1.0, %v63_v18  ;;  %vm67_vm6 = vcmp.lt.f32.partialorder %v66_v28, 0.0004427343 }
  0x3c   :  { %149 = vrcp.f32 %v69_v11  ;;  %v73_v29 = vadd.f32 1.0, %v72_v20  ;;  %vm76_vm7 = vcmp.lt.f32.partialorder %v75_v35, 0.0004427343 }
  0x3d   :  { %151 = vlog2.f32 %v60_v10  ;;  %v65_v42 = vmul.f32 %v144_v8, %v64_v24 }
  0x3e   :  { %153 = vlog2.f32 %v69_v11  ;;  %v74_v46 = vmul.f32 %v146_v9, %v73_v29 }
  0x45   :  { %v148_v14 = vpop.eup %147 }
  0x46   :  { %v150_v16 = vpop.eup %149  ;;  %v92_v17 = vmul.f32 %v148_v14, %v60_v10 }
  0x47   :  { %v93_v19 = vmul.f32 %v150_v16, %v69_v11  ;;  %v152_v27 = vpop.eup %151 }
  0x48   :  { %v94_v21 = vsub.f32 2.0, %v92_v17  ;;  %v154_v32 = vpop.eup %153  ;;  %v62_v41 = vmul.f32 0.6931472, %v152_v27 }
  0x49   :  { %v95_v22 = vsub.f32 2.0, %v93_v19  ;;  %v71_v45 = vmul.f32 0.6931472, %v154_v32 }
  0x4a   :  { %v96_v23 = vmul.f32 %v148_v14, %v94_v21  ;;  %v68_v52 = vsel %vm67_vm6, %v65_v42, %v62_v41 }
  0x4b   :  { %v97_v26 = vmul.f32 %v150_v16, %v95_v22  ;;  %v77_v54 = vsel %vm76_vm7, %v74_v46, %v71_v45  ;;  %v78_v57 = vadd.f32 %v68_v52, %v58_v49 }
  0x4c   :  { %v98_v31 = vmul.f32 %v96_v23, %v60_v10  ;;  %v79_v59 = vadd.f32 %v77_v54, %v59_v51 }
  0x4d   :  { %v99_v36 = vmul.f32 %v97_v26, %v69_v11 }
  0x4e   :  { %v100_v40 = vsub.f32 2.0, %v98_v31 }
  0x4f   :  { %v101_v44 = vsub.f32 2.0, %v99_v36 }
  0x50   :  { %v102_v47 = vmul.f32 %v100_v40, %v96_v23 }
  0x51   :  { %v103_v48 = vmul.f32 %v101_v44, %v97_v26 }
  0x52   :  { %v104_v50 = vmul.f32 %v102_v47, %v86_v39 }
  0x53   :  { %v105_v53 = vmul.f32 %v103_v48, %v87_v43 }
  0x54   :  { %v106_v55 = vsub.f32 1.0, %v104_v50 }
  0x55   :  { %v107_v56 = vsub.f32 1.0, %v105_v53 }
  0x56   :  { %v108_v58 = vmul.f32 %v106_v55, %v106_v55 }
  0x57   :  { %v109_v60 = vmul.f32 %v107_v56, %v107_v56 }
  0x58   :  { %v110_v61 = vmul.f32 %v108_v58, %v106_v55 }
  0x59   :  { %v111_v62 = vmul.f32 %v109_v60, %v107_v56 }
  0x5a   :  { %v112_v63 = vmul.f32 %v110_v61, %v78_v57 }
  0x5b   :  { %v113_v0 = vmul.f32 %v111_v62, %v79_v59 }
  0x5d   :  { %v114_v1 = vadd.f32 %v113_v0, %v112_v63 }
  0x5f   :  { %115 = vst [vmem:[#allocation7] sm:$0xff] %v114_v1 }
  0x60   :  { %210 = shalt.err (!%p207_p6)
}
  0x61   :  { %s211_s12 = scalar_lea.hbm %s305_s2, 128 }
  0x62   :  { %p212_p7 = scmp.ne.s32.totalorder %s305_s2, %s211_s12  ;;  %p215_p8 = scmp.lt.u32.totalorder %s211_s12, %s305_s2 }
  0x64   :  { %p217_p9 = pnand %p215_p8, %p212_p7 }
  0x66   :  { %220 = shalt.err (!%p217_p9)
}
  0x67   :  { %125 = dma.vmem_to_hbm [thread:$0]  %s123_s8, 128, %s305_s2, [#allocation4]  }
  0x68   :  { %225 = dma.done.wait [#allocation4], 128  }
  0x69   :  { %226 = vsyncadd [#allocation4], 4294967168 }
  0x6a   :  { %129 = vsyncpa [#allocation3], 1 }
  0x6b   :  { %130 = vsyncpa [#allocation6], 1 }
  0x6c   :  { %131 = vsyncpa [#allocation4], 1 }

</bundles_post_ra>
